<compile_context>
chip_gen: v6e
topology: v6e:2x2x1
jax: 0.10.0
libtpu: 0.0.40
codegen_flags: <defaults>
</compile_context>

<pallas_src>
import jax
import jax.numpy as jnp
from jax import lax
from jax.experimental import pallas as pl
from jax.experimental.pallas import tpu as pltpu

# ----------------------------- config ---------------------------------------
B = 2          # batch
T = 16         # Tmax
IDIM = 32      # input dim
NCH = 64       # n_chans
K = 3          # kernel_size
PAD = (K - 1) // 2
EPS = 1e-5     # torch.nn.LayerNorm default eps
M = B * T      # folded matmul M dimension


def _round_up_lanes(n):
    return ((n + 127) // 128) * 128


KC1 = _round_up_lanes(K * IDIM)   # 128  (lane-padded contraction, layer 1)
KC2 = _round_up_lanes(K * NCH)    # 256  (lane-padded contraction, layer 2)


# ----------------------------- kernel ---------------------------------------
def _shifted(x, k, masks):
    """Row m holds x[m + k - PAD], zero-filled outside each length-T batch
    segment.  x: (M, C).  XLU roll + precomputed halo mask (no concat /
    unaligned sublane slices)."""
    shift = PAD - k                       # +1, 0, -1 for K=3
    if shift == 0:
        return x
    rolled = pltpu.roll(x, shift=shift % x.shape[0], axis=0)   # XLU sublane roll
    return jnp.where(masks[shift], rolled, 0.0)


def _conv_relu_ln(x, w, b, gamma, beta, masks, xk_ref):
    """Conv1d(K, pad=PAD) + ReLU + LayerNorm(channels) as ONE im2col matmul.

    x: (M, Cin); w: (KC_pad, Cout) im2col-fused, zero-row lane-padded weights;
    b/gamma/beta: (1, Cout); xk_ref: (M, KC_pad) VMEM scratch that receives the
    lane-dense im2col operand at static lane offsets."""
    m, cin = x.shape
    kc = K * cin
    for k in range(K):                                # assemble im2col operand
        xk_ref[:, k * cin:(k + 1) * cin] = _shifted(x, k, masks)
    if xk_ref.shape[-1] > kc:                         # zero the lane padding
        xk_ref[:, kc:] = jnp.zeros((m, xk_ref.shape[-1] - kc), x.dtype)
    # Single full-depth MXU matmul (128/256-deep, lane-dense contraction).
    y = jnp.dot(xk_ref[...], w, preferred_element_type=jnp.float32) + b
    y = jnp.maximum(y, 0.0)                           # ReLU
    # LayerNorm over channels; two-pass variance (no E[x^2]-E[x]^2 cancellation).
    mean = jnp.mean(y, axis=-1, keepdims=True)
    d = y - mean
    var = jnp.mean(d * d, axis=-1, keepdims=True)
    yhat = d * lax.rsqrt(var + EPS)                   # rsqrt -> EUP
    return yhat * gamma + beta


def vp_kernel(x_ref, w1_ref, w2_ref, p_ref, o_ref, xk1_ref, xk2_ref):
    # Unpack the (8, NCH) parameter slab (one operand/DMA instead of eight).
    p = p_ref[...]
    b1, g1, be1 = p[0:1, :], p[1:2, :], p[2:3, :]
    b2, g2, be2 = p[3:4, :], p[4:5, :], p[5:6, :]
    wl = p[6:7, :]                                    # final Linear weight row
    bl = p[7:8, 0:1]                                  # final Linear bias

    # Halo masks for the folded-batch conv: built once, shared by both layers.
    t_idx = lax.broadcasted_iota(jnp.int32, (M, 1), 0) % T
    masks = {}
    for k in range(K):
        s = PAD - k
        if s > 0:
            masks[s] = t_idx >= s         # zero first s rows of each segment
        elif s < 0:
            masks[s] = t_idx < T + s      # zero last -s rows of each segment

    h = _conv_relu_ln(x_ref[...], w1_ref[...], b1, g1, be1, masks, xk1_ref)
    h = _conv_relu_ln(h, w2_ref[...], b2, g2, be2, masks, xk2_ref)
    # TODO(synk): training-mode dropout not implemented (eval-mode identity).

    # Linear(NCH -> 1): VPU multiply + lane reduce (no N=1 MXU matmul);
    # write lane-dense (1, M) row.
    out = jnp.sum(h * wl, axis=-1)                    # (M,)
    o_ref[...] = (out.reshape(1, M) + bl).astype(o_ref.dtype)


# ----------------------------- wrapper ---------------------------------------
def variance_predictor(xs, params, padding_mask=None):
    """xs: (B, T, IDIM) float32 -> (B, T, 1) float32 (inference forward)."""
    (w1, b1, g1, be1, w2, b2, g2, be2, wl, bl) = params

    x2d = xs.reshape(M, IDIM)                 # fold batch into M
    # im2col-fused + lane-padded conv weights (zero rows => identical math).
    w1p = jnp.pad(w1.reshape(K * IDIM, NCH), ((0, KC1 - K * IDIM), (0, 0)))
    w2p = jnp.pad(w2.reshape(K * NCH, NCH), ((0, KC2 - K * NCH), (0, 0)))
    # Pack all tiny vectors into one (8, NCH) slab -> single DMA.
    slab = jnp.concatenate(
        [b1, g1, be1, b2, g2, be2, wl.reshape(1, NCH),
         jnp.broadcast_to(bl.reshape(1, 1), (1, NCH))], axis=0)

    vmem = pl.BlockSpec(memory_space=pltpu.MemorySpace.VMEM)
    out = pl.pallas_call(                      # single invocation, no grid
        vp_kernel,
        out_shape=jax.ShapeDtypeStruct((1, M), jnp.float32),
        in_specs=[vmem] * 4,
        out_specs=vmem,
        scratch_shapes=[pltpu.VMEM((M, KC1), jnp.float32),
                        pltpu.VMEM((M, KC2), jnp.float32)],
    )(x2d, w1p, w2p, slab)

    out = out.reshape(B, T, 1)
    if padding_mask is not None:
        # TODO(synk): fuse the mask into the kernel if called per decode step.
        out = jnp.where(padding_mask[..., None], 0.0, out)
    return out


# ------------------------- pure-JAX reference --------------------------------
def ref_forward(xs, params):
    (w1, b1, g1, be1, w2, b2, g2, be2, wl, bl) = params
    hi = lax.Precision.HIGHEST

    def layer(x, w, b, gamma, beta):
        pad = (K - 1) // 2
        xp = jnp.pad(x, ((0, 0), (pad, pad), (0, 0)))
        y = sum(jnp.einsum('btc,cd->btd', xp[:, k:k + x.shape[1]], w[k],
                           precision=hi)
                for k in range(K)) + b
        y = jnp.maximum(y, 0.0)
        mean = jnp.mean(y, axis=-1, keepdims=True)
        var = jnp.mean((y - mean) ** 2, axis=-1, keepdims=True)
        return (y - mean) / jnp.sqrt(var + EPS) * gamma + beta

    h = layer(xs, w1, b1, g1, be1)
    h = layer(h, w2, b2, g2, be2)
    return jnp.einsum('btc,cd->btd', h, wl, precision=hi) + bl


# ----------------------------- main ------------------------------------------
if __name__ == "__main__":
    key = jax.random.PRNGKey(0)
    ks = jax.random.split(key, 12)

    xs = jax.random.normal(ks[0], (B, T, IDIM), jnp.float32)

    # Conv weights stored as (K, Cin, Cout)  (== torch (Cout, Cin, K) permuted).
    w1 = jax.random.normal(ks[1], (K, IDIM, NCH), jnp.float32) * 0.1
    b1 = jax.random.normal(ks[2], (1, NCH), jnp.float32) * 0.1
    g1 = 1.0 + 0.1 * jax.random.normal(ks[3], (1, NCH), jnp.float32)
    be1 = 0.1 * jax.random.normal(ks[4], (1, NCH), jnp.float32)

    w2 = jax.random.normal(ks[5], (K, NCH, NCH), jnp.float32) * 0.1
    b2 = jax.random.normal(ks[6], (1, NCH), jnp.float32) * 0.1
    g2 = 1.0 + 0.1 * jax.random.normal(ks[7], (1, NCH), jnp.float32)
    be2 = 0.1 * jax.random.normal(ks[8], (1, NCH), jnp.float32)

    wl = jax.random.normal(ks[9], (NCH, 1), jnp.float32) * 0.1
    bl = jax.random.normal(ks[10], (1, 1), jnp.float32) * 0.1

    params = (w1, b1, g1, be1, w2, b2, g2, be2, wl, bl)

    out = variance_predictor(xs, params)
    out = jax.block_until_ready(out)

    ref = ref_forward(xs, params)
    assert out.shape == (B, T, 1)
    assert jnp.allclose(out, ref, atol=1e-4, rtol=1e-4), "mismatch vs reference"

    print("KERNEL_OK")
</pallas_src>

<mosaic_0001>
module attributes {stable_mosaic.version = 11 : i64} {
  func.func @vp_kernel(%arg0: memref<32x32xf32, #tpu.memory_space<vmem>>, %arg1: memref<128x64xf32, #tpu.memory_space<vmem>>, %arg2: memref<256x64xf32, #tpu.memory_space<vmem>>, %arg3: memref<8x64xf32, #tpu.memory_space<vmem>>, %arg4: memref<1x32xf32, #tpu.memory_space<vmem>>, %arg5: memref<32x128xf32, #tpu.memory_space<vmem>>, %arg6: memref<32x256xf32, #tpu.memory_space<vmem>>) attributes {dimension_semantics = [], scalar_prefetch = 0 : i64, scratch_operands = 2 : i64, tpu.core_type = #tpu.core_type<tc>} {
    %c0 = arith.constant 0 : index
    %c0_0 = arith.constant 0 : index
    %0 = vector.load %arg3[%c0, %c0_0] : memref<8x64xf32, #tpu.memory_space<vmem>>, vector<8x64xf32>
    %1 = vector.extract_strided_slice %0 {offsets = [0, 0], sizes = [1, 64], strides = [1, 1]} : vector<8x64xf32> to vector<1x64xf32>
    %2 = vector.extract_strided_slice %0 {offsets = [1, 0], sizes = [1, 64], strides = [1, 1]} : vector<8x64xf32> to vector<1x64xf32>
    %3 = vector.extract_strided_slice %0 {offsets = [2, 0], sizes = [1, 64], strides = [1, 1]} : vector<8x64xf32> to vector<1x64xf32>
    %4 = vector.extract_strided_slice %0 {offsets = [3, 0], sizes = [1, 64], strides = [1, 1]} : vector<8x64xf32> to vector<1x64xf32>
    %5 = vector.extract_strided_slice %0 {offsets = [4, 0], sizes = [1, 64], strides = [1, 1]} : vector<8x64xf32> to vector<1x64xf32>
    %6 = vector.extract_strided_slice %0 {offsets = [5, 0], sizes = [1, 64], strides = [1, 1]} : vector<8x64xf32> to vector<1x64xf32>
    %7 = vector.extract_strided_slice %0 {offsets = [6, 0], sizes = [1, 64], strides = [1, 1]} : vector<8x64xf32> to vector<1x64xf32>
    %8 = vector.extract_strided_slice %0 {offsets = [7, 0], sizes = [1, 1], strides = [1, 1]} : vector<8x64xf32> to vector<1x1xf32>
    %9 = tpu.iota {dimensions = array<i32: 0>} : vector<32x1xi32>
    %c16_i32 = arith.constant 16 : i32
    %c0_i32 = arith.constant 0 : i32
    %10 = arith.cmpi eq, %c16_i32, %c0_i32 : i32
    %c1_i32 = arith.constant 1 : i32
    %11 = arith.select %10, %c1_i32, %c16_i32 : i32
    %12 = vector.broadcast %11 : i32 to vector<32x1xi32>
    %13 = arith.remsi %9, %12 : vector<32x1xi32>
    %c0_i32_1 = arith.constant 0 : i32
    %14 = vector.broadcast %c0_i32_1 : i32 to vector<32x1xi32>
    %15 = arith.cmpi ne, %13, %14 : vector<32x1xi32>
    %c0_i32_2 = arith.constant 0 : i32
    %16 = vector.broadcast %c0_i32_2 : i32 to vector<32x1xi32>
    %17 = arith.cmpi slt, %13, %16 : vector<32x1xi32>
    %c0_i32_3 = arith.constant 0 : i32
    %18 = arith.cmpi slt, %11, %c0_i32_3 : i32
    %19 = vector.broadcast %18 : i1 to vector<32x1xi1>
    %20 = vector.broadcast %19 : vector<32x1xi1> to vector<32x1xi1>
    %21 = arith.xori %17, %20 : vector<32x1xi1>
    %22 = arith.andi %21, %15 : vector<32x1xi1>
    %23 = vector.broadcast %11 : i32 to vector<32x1xi32>
    %24 = arith.addi %13, %23 : vector<32x1xi32>
    %25 = arith.select %22, %24, %13 : vector<32x1xi1>, vector<32x1xi32>
    %c1_i32_4 = arith.constant 1 : i32
    %26 = vector.broadcast %c1_i32_4 : i32 to vector<32x1xi32>
    %27 = arith.cmpi sge, %25, %26 : vector<32x1xi32>
    %c15_i32 = arith.constant 15 : i32
    %28 = vector.broadcast %c15_i32 : i32 to vector<32x1xi32>
    %29 = arith.cmpi slt, %25, %28 : vector<32x1xi32>
    %c0_5 = arith.constant 0 : index
    %c0_6 = arith.constant 0 : index
    %30 = vector.load %arg0[%c0_5, %c0_6] : memref<32x32xf32, #tpu.memory_space<vmem>>, vector<32x32xf32>
    %c0_7 = arith.constant 0 : index
    %c0_8 = arith.constant 0 : index
    %31 = vector.load %arg1[%c0_7, %c0_8] : memref<128x64xf32, #tpu.memory_space<vmem>>, vector<128x64xf32>
    %c1_i32_9 = arith.constant 1 : i32
    %32 = tpu.dynamic_rotate %30 by %c1_i32_9 dim 0 : vector<32x32xf32>, i32 -> vector<32x32xf32>
    %cst = arith.constant 0.000000e+00 : f32
    %33 = vector.shape_cast %27 : vector<32x1xi1> to vector<32x1xi1>
    %34 = vector.broadcast %33 : vector<32x1xi1> to vector<32x32xi1>
    %35 = vector.broadcast %cst : f32 to vector<32x32xf32>
    %36 = arith.select %34, %32, %35 : vector<32x32xi1>, vector<32x32xf32>
    %c0_10 = arith.constant 0 : index
    %c0_11 = arith.constant 0 : index
    %37 = vector.load %arg5[%c0_10, %c0_11] : memref<32x128xf32, #tpu.memory_space<vmem>>, vector<32x32xf32>
    tpu.vector_store %arg5[%c0_10, %c0_11], %36 {strides = array<i32>} : memref<32x128xf32, #tpu.memory_space<vmem>>, vector<32x32xf32>,
    %c0_12 = arith.constant 0 : index
    %c32 = arith.constant 32 : index
    %38 = vector.load %arg5[%c0_12, %c32] : memref<32x128xf32, #tpu.memory_space<vmem>>, vector<32x32xf32>
    tpu.vector_store %arg5[%c0_12, %c32], %30 {strides = array<i32>} : memref<32x128xf32, #tpu.memory_space<vmem>>, vector<32x32xf32>,
    %c31_i32 = arith.constant 31 : i32
    %39 = tpu.dynamic_rotate %30 by %c31_i32 dim 0 : vector<32x32xf32>, i32 -> vector<32x32xf32>
    %cst_13 = arith.constant 0.000000e+00 : f32
    %40 = vector.shape_cast %29 : vector<32x1xi1> to vector<32x1xi1>
    %41 = vector.broadcast %40 : vector<32x1xi1> to vector<32x32xi1>
    %42 = vector.broadcast %cst_13 : f32 to vector<32x32xf32>
    %43 = arith.select %41, %39, %42 : vector<32x32xi1>, vector<32x32xf32>
    %c0_14 = arith.constant 0 : index
    %c64 = arith.constant 64 : index
    %44 = vector.load %arg5[%c0_14, %c64] : memref<32x128xf32, #tpu.memory_space<vmem>>, vector<32x32xf32>
    tpu.vector_store %arg5[%c0_14, %c64], %43 {strides = array<i32>} : memref<32x128xf32, #tpu.memory_space<vmem>>, vector<32x32xf32>,
    %cst_15 = arith.constant 0.000000e+00 : f32
    %45 = vector.broadcast %cst_15 : f32 to vector<32x32xf32>
    %c0_16 = arith.constant 0 : index
    %c96 = arith.constant 96 : index
    %46 = vector.load %arg5[%c0_16, %c96] : memref<32x128xf32, #tpu.memory_space<vmem>>, vector<32x32xf32>
    tpu.vector_store %arg5[%c0_16, %c96], %45 {strides = array<i32>} : memref<32x128xf32, #tpu.memory_space<vmem>>, vector<32x32xf32>,
    %c0_17 = arith.constant 0 : index
    %c0_18 = arith.constant 0 : index
    %47 = vector.load %arg5[%c0_17, %c0_18] : memref<32x128xf32, #tpu.memory_space<vmem>>, vector<32x128xf32>
    %cst_19 = arith.constant dense<0.000000e+00> : vector<32x64xf32>
    %48 = tpu.matmul %47, %31, %cst_19 {dimension_numbers = #tpu.dot_dimension_numbers<[1], [0], [0], [1], [0, 0, 1, 1], [], []>} : vector<32x128xf32>, vector<128x64xf32>, vector<32x64xf32> -> vector<32x64xf32>
    %49 = vector.broadcast %1 : vector<1x64xf32> to vector<32x64xf32>
    %50 = arith.addf %48, %49 : vector<32x64xf32>
    %cst_20 = arith.constant 0.000000e+00 : f32
    %51 = vector.broadcast %cst_20 : f32 to vector<32x64xf32>
    %52 = arith.maximumf %50, %51 : vector<32x64xf32>
    %cst_21 = arith.constant dense<0.000000e+00> : vector<32xf32>
    %53 = vector.multi_reduction <add>, %52, %cst_21 [1] : vector<32x64xf32> to vector<32xf32>
    %54 = vector.shape_cast %53 : vector<32xf32> to vector<32x1xf32>
    %cst_22 = arith.constant 6.400000e+01 : f32
    %55 = vector.broadcast %cst_22 : f32 to vector<32x1xf32>
    %56 = arith.divf %54, %55 : vector<32x1xf32>
    %57 = vector.broadcast %56 : vector<32x1xf32> to vector<32x64xf32>
    %58 = arith.subf %52, %57 : vector<32x64xf32>
    %59 = arith.mulf %58, %58 : vector<32x64xf32>
    %cst_23 = arith.constant dense<0.000000e+00> : vector<32xf32>
    %60 = vector.multi_reduction <add>, %59, %cst_23 [1] : vector<32x64xf32> to vector<32xf32>
    %61 = vector.shape_cast %60 : vector<32xf32> to vector<32x1xf32>
    %cst_24 = arith.constant 6.400000e+01 : f32
    %62 = vector.broadcast %cst_24 : f32 to vector<32x1xf32>
    %63 = arith.divf %61, %62 : vector<32x1xf32>
    %cst_25 = arith.constant 9.99999974E-6 : f32
    %64 = vector.broadcast %cst_25 : f32 to vector<32x1xf32>
    %65 = arith.addf %63, %64 : vector<32x1xf32>
    %66 = math.rsqrt %65 : vector<32x1xf32>
    %67 = vector.broadcast %66 : vector<32x1xf32> to vector<32x64xf32>
    %68 = arith.mulf %58, %67 : vector<32x64xf32>
    %69 = vector.broadcast %2 : vector<1x64xf32> to vector<32x64xf32>
    %70 = arith.mulf %68, %69 : vector<32x64xf32>
    %71 = vector.broadcast %3 : vector<1x64xf32> to vector<32x64xf32>
    %72 = arith.addf %70, %71 : vector<32x64xf32>
    %c0_26 = arith.constant 0 : index
    %c0_27 = arith.constant 0 : index
    %73 = vector.load %arg2[%c0_26, %c0_27] : memref<256x64xf32, #tpu.memory_space<vmem>>, vector<256x64xf32>
    %c1_i32_28 = arith.constant 1 : i32
    %74 = tpu.dynamic_rotate %72 by %c1_i32_28 dim 0 : vector<32x64xf32>, i32 -> vector<32x64xf32>
    %cst_29 = arith.constant 0.000000e+00 : f32
    %75 = vector.shape_cast %27 : vector<32x1xi1> to vector<32x1xi1>
    %76 = vector.broadcast %75 : vector<32x1xi1> to vector<32x64xi1>
    %77 = vector.broadcast %cst_29 : f32 to vector<32x64xf32>
    %78 = arith.select %76, %74, %77 : vector<32x64xi1>, vector<32x64xf32>
    %c0_30 = arith.constant 0 : index
    %c0_31 = arith.constant 0 : index
    %79 = vector.load %arg6[%c0_30, %c0_31] : memref<32x256xf32, #tpu.memory_space<vmem>>, vector<32x64xf32>
    tpu.vector_store %arg6[%c0_30, %c0_31], %78 {strides = array<i32>} : memref<32x256xf32, #tpu.memory_space<vmem>>, vector<32x64xf32>,
    %c0_32 = arith.constant 0 : index
    %c64_33 = arith.constant 64 : index
    %80 = vector.load %arg6[%c0_32, %c64_33] : memref<32x256xf32, #tpu.memory_space<vmem>>, vector<32x64xf32>
    tpu.vector_store %arg6[%c0_32, %c64_33], %72 {strides = array<i32>} : memref<32x256xf32, #tpu.memory_space<vmem>>, vector<32x64xf32>,
    %c31_i32_34 = arith.constant 31 : i32
    %81 = tpu.dynamic_rotate %72 by %c31_i32_34 dim 0 : vector<32x64xf32>, i32 -> vector<32x64xf32>
    %cst_35 = arith.constant 0.000000e+00 : f32
    %82 = vector.shape_cast %29 : vector<32x1xi1> to vector<32x1xi1>
    %83 = vector.broadcast %82 : vector<32x1xi1> to vector<32x64xi1>
    %84 = vector.broadcast %cst_35 : f32 to vector<32x64xf32>
    %85 = arith.select %83, %81, %84 : vector<32x64xi1>, vector<32x64xf32>
    %c0_36 = arith.constant 0 : index
    %c128 = arith.constant 128 : index
    %86 = vector.load %arg6[%c0_36, %c128] : memref<32x256xf32, #tpu.memory_space<vmem>>, vector<32x64xf32>
    tpu.vector_store %arg6[%c0_36, %c128], %85 {strides = array<i32>} : memref<32x256xf32, #tpu.memory_space<vmem>>, vector<32x64xf32>,
    %cst_37 = arith.constant 0.000000e+00 : f32
    %87 = vector.broadcast %cst_37 : f32 to vector<32x64xf32>
    %c0_38 = arith.constant 0 : index
    %c192 = arith.constant 192 : index
    %88 = vector.load %arg6[%c0_38, %c192] : memref<32x256xf32, #tpu.memory_space<vmem>>, vector<32x64xf32>
    tpu.vector_store %arg6[%c0_38, %c192], %87 {strides = array<i32>} : memref<32x256xf32, #tpu.memory_space<vmem>>, vector<32x64xf32>,
    %c0_39 = arith.constant 0 : index
    %c0_40 = arith.constant 0 : index
    %89 = vector.load %arg6[%c0_39, %c0_40] : memref<32x256xf32, #tpu.memory_space<vmem>>, vector<32x256xf32>
    %cst_41 = arith.constant dense<0.000000e+00> : vector<32x64xf32>
    %90 = tpu.matmul %89, %73, %cst_41 {dimension_numbers = #tpu.dot_dimension_numbers<[1], [0], [0], [1], [0, 0, 1, 1], [], []>} : vector<32x256xf32>, vector<256x64xf32>, vector<32x64xf32> -> vector<32x64xf32>
    %91 = vector.broadcast %4 : vector<1x64xf32> to vector<32x64xf32>
    %92 = arith.addf %90, %91 : vector<32x64xf32>
    %cst_42 = arith.constant 0.000000e+00 : f32
    %93 = vector.broadcast %cst_42 : f32 to vector<32x64xf32>
    %94 = arith.maximumf %92, %93 : vector<32x64xf32>
    %cst_43 = arith.constant dense<0.000000e+00> : vector<32xf32>
    %95 = vector.multi_reduction <add>, %94, %cst_43 [1] : vector<32x64xf32> to vector<32xf32>
    %96 = vector.shape_cast %95 : vector<32xf32> to vector<32x1xf32>
    %cst_44 = arith.constant 6.400000e+01 : f32
    %97 = vector.broadcast %cst_44 : f32 to vector<32x1xf32>
    %98 = arith.divf %96, %97 : vector<32x1xf32>
    %99 = vector.broadcast %98 : vector<32x1xf32> to vector<32x64xf32>
    %100 = arith.subf %94, %99 : vector<32x64xf32>
    %101 = arith.mulf %100, %100 : vector<32x64xf32>
    %cst_45 = arith.constant dense<0.000000e+00> : vector<32xf32>
    %102 = vector.multi_reduction <add>, %101, %cst_45 [1] : vector<32x64xf32> to vector<32xf32>
    %103 = vector.shape_cast %102 : vector<32xf32> to vector<32x1xf32>
    %cst_46 = arith.constant 6.400000e+01 : f32
    %104 = vector.broadcast %cst_46 : f32 to vector<32x1xf32>
    %105 = arith.divf %103, %104 : vector<32x1xf32>
    %cst_47 = arith.constant 9.99999974E-6 : f32
    %106 = vector.broadcast %cst_47 : f32 to vector<32x1xf32>
    %107 = arith.addf %105, %106 : vector<32x1xf32>
    %108 = math.rsqrt %107 : vector<32x1xf32>
    %109 = vector.broadcast %108 : vector<32x1xf32> to vector<32x64xf32>
    %110 = arith.mulf %100, %109 : vector<32x64xf32>
    %111 = vector.broadcast %5 : vector<1x64xf32> to vector<32x64xf32>
    %112 = arith.mulf %110, %111 : vector<32x64xf32>
    %113 = vector.broadcast %6 : vector<1x64xf32> to vector<32x64xf32>
    %114 = arith.addf %112, %113 : vector<32x64xf32>
    %115 = vector.broadcast %7 : vector<1x64xf32> to vector<32x64xf32>
    %116 = arith.mulf %114, %115 : vector<32x64xf32>
    %cst_48 = arith.constant dense<0.000000e+00> : vector<32xf32>
    %117 = vector.multi_reduction <add>, %116, %cst_48 [1] : vector<32x64xf32> to vector<32xf32>
    %118 = vector.shape_cast %117 : vector<32xf32> to vector<1x32xf32>
    %119 = vector.broadcast %8 : vector<1x1xf32> to vector<1x32xf32>
    %120 = arith.addf %118, %119 : vector<1x32xf32>
    %c0_49 = arith.constant 0 : index
    %c0_50 = arith.constant 0 : index
    %121 = vector.load %arg4[%c0_49, %c0_50] : memref<1x32xf32, #tpu.memory_space<vmem>>, vector<1x32xf32>
    tpu.vector_store %arg4[%c0_49, %c0_50], %120 {strides = array<i32>} : memref<1x32xf32, #tpu.memory_space<vmem>>, vector<1x32xf32>,
    return
  }
}

</mosaic_0001>

<bundles_post_ra>
// kernel: tpu_custom_call.1
= control target key start
LH: loop header
LB: loop body
LE: loop exit
PB: predicated region body
PF: predicated region fallthrough
CT: control target
= control target key end

     0   :  { %v19_v1 = vlaneseq  ;;  %s859_s21 = smov 32   ;;  %vm121_vm1 = vcmask 261120   ;;  %s1244_s0 = inlined_call_operand.vmem [shape: f32[32,32], index: 0, kind: input, shape index: {}]   ;;  %s1245_s1 = inlined_call_operand.vmem [shape: f32[128,64], index: 1, kind: input, shape index: {}]   ;;  %s1246_s2 = inlined_call_operand.vmem [shape: f32[256,64], index: 2, kind: input, shape index: {}]   ;;  %s1247_s3 = inlined_call_operand.vmem [shape: f32[8,64], index: 3, kind: input, shape index: {}]   ;;  %s1248_s4 = inlined_call_operand.hbm [shape: f32[1,32], index: 4, kind: output, shape index: {}]  }
   0x1   :  { %v892_v0 = vld [vmem:[%s1244_s0] sm:$0xff]  ;;  %v81_v2 = vld [vmem:[%s1244_s0 + $0x8] sm:$0xff]  ;;  %v82_v3 = vld [vmem:[%s1244_s0 + $0x10] sm:$0xff] }
   0x2   :  { %130 = vrot.lane.b32.xlu0 %v892_v0, %s859_s21  ;;  %v147_v4 = vrot.slane %v892_v0, 1  ;;  %v148_v5 = vrot.slane %v81_v2, 1  ;;  %v99_v6 = vld [vmem:[%s1245_s1 + $0x78] sm:$0xff]  ;;  %v907_v7 = vshrl.u32 %v19_v1, 7  ;;  %v149_v8 = vrot.slane %v82_v3, 1  ;;  %v98_v10 = vld [vmem:[%s1245_s1 + $0x70] sm:$0xff] }
   0x3   :  { %v83_v9 = vld [vmem:[%s1244_s0 + $0x18] sm:$0xff]  ;;  %776 = vmatprep.subr.mxu0 %v99_v6  ;;  %v100_v11 = vrot.slane %v892_v0, 7  ;;  %v97_v15 = vld [vmem:[%s1245_s1 + $0x68] sm:$0xff]  ;;  %s860_s0 = smov 64   ;;  %v96_v21 = vld [vmem:[%s1245_s1 + $0x60] sm:$0xff]  ;;  %v101_v25 = vrot.slane %v81_v2, 7 }
   0x4   :  { %v103_v12 = vrot.slane %v83_v9, 7  ;;  %777 = vmatpush3.msra.mxu0 %v99_v6  ;;  %vm151_vm0 = vcmp.lt.s32.totalorder %v907_v7, 7  ;;  %v21_v13 = vadd.s32 8, %v907_v7  ;;  %v23_v14 = vadd.s32 24, %v907_v7  ;;  %v95_v23 = vld [vmem:[%s1245_s1 + $0x58] sm:$0xff] }
   0x5   :  { %778 = vmatprep.subr.mxu0 %v98_v10  ;;  %v28_v16 = vand.u32 15, %v907_v7  ;;  %v154_v17 = vsel %vm151_vm0, %v147_v4, %v148_v5  ;;  %v150_v18 = vrot.slane %v83_v9, 1  ;;  %v153_v20 = vsel %vm151_vm0, %v148_v5, %v149_v8 }
   0x6   :  { %132 = vrot.lane.b32.xlu0 %v81_v2, %s859_s21  ;;  %172 = vrot.lane.b32.xlu1 %v154_v17, %s860_s0  ;;  %v35_v19 = vand.u32 15, %v21_v13  ;;  %vm104_vm3 = vcmp.lt.s32.totalorder %v907_v7, 1  ;;  %v102_v26 = vrot.slane %v82_v3, 7  ;;  %v49_v28 = vand.u32 15, %v23_v14 }
   0x7   :  { %779 = vmatpush3.msra.mxu0 %v98_v10  ;;  %vm932_vm2 = vcmp.ge.s32.totalorder %v28_v16, 1  ;;  %v108_v24 = vsel %vm104_vm3, %v103_v12, %v100_v11  ;;  %v22_v30 = vadd.s32 16, %v907_v7 }
   0x8   :  { %780 = vmatprep.subr.mxu0 %v97_v15  ;;  %vm942_vm4 = vcmp.lt.s32.totalorder %v35_v19, 15  ;;  %v117_v29 = vsel %vm932_vm2, %v108_v24, 0.0 }
   0x9   :  { %781 = vmatpush3.msra.mxu0 %v97_v15 }
   0xa   :  { %9 = vsyncpa [#allocation5], 0  ;;  %v165_v31 = vsel %vm942_vm4, %v153_v20, 0.0  ;;  %134 = vrot.lane.b32.xlu0 %v82_v3, %s859_s21  ;;  %782 = vmatprep.subr.mxu0 %v96_v21  ;;  %122 = vst.msk [vmem:[#allocation2] sm:$0xff] %vm121_vm1, %v117_v29  ;;  %v107_v32 = vsel %vm104_vm3, %v100_v11, %v101_v25  ;;  %v152_v33 = vsel %vm151_vm0, %v149_v8, %v150_v18  ;;  %v94_v34 = vld [vmem:[%s1245_s1 + $0x50] sm:$0xff]  ;;  %v42_v35 = vand.u32 15, %v22_v30 }
   0xb   :  { %174 = vrot.lane.b32.xlu1 %v165_v31, %s860_s0  ;;  %783 = vmatpush3.msra.mxu0 %v96_v21  ;;  %123 = vst.msk [vmem:[#allocation2 + $0x8] sm:$0xff] %vm121_vm1, %v107_v32  ;;  %v106_v36 = vsel %vm104_vm3, %v101_v25, %v102_v26  ;;  %v105_v37 = vsel %vm104_vm3, %v102_v26, %v103_v12  ;;  %vm967_vm5 = vcmp.lt.s32.totalorder %v49_v28, 15  ;;  %v93_v40 = vld [vmem:[%s1245_s1 + $0x48] sm:$0xff]  ;;  %v92_v43 = vld [vmem:[%s1245_s1 + $0x40] sm:$0xff]  ;;  %v91_v45 = vld [vmem:[%s1245_s1 + $0x38] sm:$0xff]  ;;  %vm142_vm7 = vcmask 523520  }
   0xc   :  { %784 = vmatprep.subr.mxu0 %v95_v23  ;;  %125 = vst.msk [vmem:[#allocation2 + $0x18] sm:$0xff] %vm121_vm1, %v105_v37  ;;  %v155_v39 = vsel %vm151_vm0, %v150_v18, %v147_v4  ;;  %vm976_vm6 = vcmp.ge.s32.totalorder %v42_v35, 1  ;;  %v90_v46 = vld [vmem:[%s1245_s1 + $0x30] sm:$0xff]  ;;  %v89_v47 = vld [vmem:[%s1245_s1 + $0x28] sm:$0xff]  ;;  %v88_v48 = vld [vmem:[%s1245_s1 + $0x20] sm:$0xff]  ;;  %vm184_vm8 = vcmask 785920  }
   0xd   :  { %785 = vmatpush3.msra.mxu0 %v95_v23  ;;  %v119_v42 = vsel %vm976_vm6, %v106_v36, 0.0  ;;  %v167_v44 = vsel %vm967_vm5, %v155_v39, 0.0  ;;  %v87_v49 = vld [vmem:[%s1245_s1 + $0x18] sm:$0xff]  ;;  %v86_v50 = vld [vmem:[%s1245_s1 + $0x10] sm:$0xff]  ;;  %v85_v51 = vld [vmem:[%s1245_s1 + $0x8] sm:$0xff]  ;;  %vm189_vm9 = vcmask 1048320  }
   0xe   :  { %176 = vrot.lane.b32.xlu0 %v152_v33, %s860_s0  ;;  %786 = vmatprep.subr.mxu0 %v94_v34  ;;  %124 = vst.msk [vmem:[#allocation2 + $0x10] sm:$0xff] %vm121_vm1, %v119_v42  ;;  %v84_v52 = vld [vmem:[%s1245_s1] sm:$0xff]  ;;  %v861_v56 = vmov 0.0   ;;  %v200_v3 = vsub.s32 0, %v907_v7  ;;  %vm291_vm10 = vcmask 523264   ;;  %vm425_vm11 = vcmask 1048064  }
   0xf   :  { %136 = vrot.lane.b32.xlu1 %v83_v9, %s859_s21  ;;  %787 = vmatpush3.msra.mxu0 %v94_v34  ;;  %v1035_v4 = vld [vmem:[%s1247_s3] sm:$0xff]  ;;  %vm679_vm12 = vcmask 130112   ;;  %vm686_vm13 = vcmask 195712   ;;  %vm693_vm14 = vcmask 261312   ;;  %vm696_vm15 = vcmask 253952  }
  0x10   :  { %788 = vmatprep.subr.mxu0 %v93_v40  ;;  %v201_v5 = vrot.slane %v1035_v4, %v200_v3  ;;  %v383_v3 = vld [vmem:[%s1246_s2 + $0xb0] sm:$0xff] }
  0x11   :  { %789 = vmatpush3.msra.mxu0 %v93_v40 }
  0x12   :  { %790 = vmatprep.subr.mxu0 %v92_v43 }
  0x13   :  { %178 = vrot.lane.b32.xlu1 %v167_v44, %s860_s0  ;;  %791 = vmatpush3.msra.mxu0 %v92_v43 }
  0x14   :  { %792 = vmatprep.subr.mxu0 %v91_v45 }
  0x15   :  { %793 = vmatpush3.msra.mxu0 %v91_v45 }
  0x16   :  { %794 = vmatprep.subr.mxu0 %v90_v46 }
  0x17   :  { %795 = vmatpush3.msra.mxu0 %v90_v46 }
  0x18   :  { %796 = vmatprep.subr.mxu0 %v89_v47 }
  0x19   :  { %797 = vmatpush3.msra.mxu0 %v89_v47  ;;  %v392_v47 = vld [vmem:[%s1246_s2 + $0xf8] sm:$0xff] }
  0x1a   :  { %798 = vmatprep.subr.mxu0 %v88_v48  ;;  %732 = vmatprep.subr.mxu1 %v392_v47 }
  0x1b   :  { %799 = vmatpush3.msra.mxu0 %v88_v48  ;;  %v376_v48 = vld [vmem:[%s1246_s2 + $0x78] sm:$0xff] }
  0x1c   :  { %800 = vmatprep.subr.mxu0 %v87_v49  ;;  %733 = vmatpush3.msra.mxu1 %v376_v48 }
  0x1d   :  { %801 = vmatpush3.msra.mxu0 %v87_v49  ;;  %v391_v49 = vld [vmem:[%s1246_s2 + $0xf0] sm:$0xff] }
  0x1e   :  { %802 = vmatprep.subr.mxu0 %v86_v50  ;;  %734 = vmatprep.subr.mxu1 %v391_v49 }
  0x1f   :  { %803 = vmatpush3.msra.mxu0 %v86_v50  ;;  %v375_v50 = vld [vmem:[%s1246_s2 + $0x70] sm:$0xff] }
  0x20   :  { %804 = vmatprep.subr.mxu0 %v85_v51  ;;  %735 = vmatpush3.msra.mxu1 %v375_v50 }
  0x21   :  { %805 = vmatpush3.msra.mxu0 %v85_v51  ;;  %v390_v51 = vld [vmem:[%s1246_s2 + $0xe8] sm:$0xff] }
  0x22   :  { %806 = vmatprep.subr.mxu0 %v84_v52  ;;  %736 = vmatprep.subr.mxu1 %v390_v51 }
  0x23   :  { %807 = vmatpush3.msra.mxu0 %v84_v52  ;;  %v374_v52 = vld [vmem:[%s1246_s2 + $0x68] sm:$0xff] }
  0x24   :  { %737 = vmatpush3.msra.mxu1 %v374_v52 }
  0x74   :  { %v131_v53 = vpop.permute.xlu0 %130 }
  0x75   :  { %143 = vst.msk [vmem:[#allocation2] sm:$0xff] %vm142_vm7, %v131_v53  ;;  %v389_v53 = vld [vmem:[%s1246_s2 + $0xe0] sm:$0xff] }
  0x76   :  { %738 = vmatprep.subr.mxu1 %v389_v53 }
  0x78   :  { %v133_v54 = vpop.permute.xlu0 %132  ;;  %v173_v55 = vpop.permute.xlu1 %172 }
  0x79   :  { %144 = vst.msk [vmem:[#allocation2 + $0x8] sm:$0xff] %vm142_vm7, %v133_v54  ;;  %v373_v54 = vld [vmem:[%s1246_s2 + $0x60] sm:$0xff] }
  0x7a   :  { %185 = vst.msk [vmem:[#allocation2] sm:$0xff] %vm184_vm8, %v173_v55  ;;  %v388_v55 = vld [vmem:[%s1246_s2 + $0xd8] sm:$0xff]  ;;  %739 = vmatpush3.msra.mxu1 %v373_v54 }
  0x7b   :  { %190 = vst.msk [vmem:[#allocation2] sm:$0xff] %vm189_vm9, %v861_v56  ;;  %740 = vmatprep.subr.mxu1 %v388_v55 }
  0x7c   :  { %v135_v57 = vpop.permute.xlu0 %134 }
  0x7d   :  { %v175_v58 = vpop.permute.xlu1 %174  ;;  %145 = vst.msk [vmem:[#allocation2 + $0x10] sm:$0xff] %vm142_vm7, %v135_v57  ;;  %v372_v57 = vld [vmem:[%s1246_s2 + $0x58] sm:$0xff] }
  0x7e   :  { %186 = vst.msk [vmem:[#allocation2 + $0x8] sm:$0xff] %vm184_vm8, %v175_v58  ;;  %v387_v58 = vld [vmem:[%s1246_s2 + $0xd0] sm:$0xff]  ;;  %741 = vmatpush3.msra.mxu1 %v372_v57 }
  0x7f   :  { %191 = vst.msk [vmem:[#allocation2 + $0x8] sm:$0xff] %vm189_vm9, %v861_v56  ;;  %742 = vmatprep.subr.mxu1 %v387_v58 }
  0x80   :  { %v177_v59 = vpop.permute.xlu0 %176 }
  0x81   :  { %v137_v60 = vpop.permute.xlu1 %136  ;;  %187 = vst.msk [vmem:[#allocation2 + $0x10] sm:$0xff] %vm184_vm8, %v177_v59  ;;  %v371_v59 = vld [vmem:[%s1246_s2 + $0x50] sm:$0xff] }
  0x82   :  { %146 = vst.msk [vmem:[#allocation2 + $0x18] sm:$0xff] %vm142_vm7, %v137_v60  ;;  %v194_v61 = vld [vmem:[#allocation2] sm:$0xff]  ;;  %v386_v60 = vld [vmem:[%s1246_s2 + $0xc8] sm:$0xff]  ;;  %743 = vmatpush3.msra.mxu1 %v371_v59 }
  0x83   :  { %192 = vst.msk [vmem:[#allocation2 + $0x10] sm:$0xff] %vm189_vm9, %v861_v56  ;;  %808 = vmatprep.mubr.f32.mxu0 %v194_v61  ;;  %v370_v61 = vld [vmem:[%s1246_s2 + $0x48] sm:$0xff]  ;;  %744 = vmatprep.subr.mxu1 %v386_v60 }
  0x84   :  { %745 = vmatpush3.msra.mxu1 %v370_v61 }
  0x85   :  { %v179_v62 = vpop.permute.xlu1 %178 }
  0x86   :  { %188 = vst.msk [vmem:[#allocation2 + $0x18] sm:$0xff] %vm184_vm8, %v179_v62  ;;  %v195_v63 = vld [vmem:[#allocation2 + $0x8] sm:$0xff]  ;;  %v385_v62 = vld [vmem:[%s1246_s2 + $0xc0] sm:$0xff] }
  0x87   :  { %193 = vst.msk [vmem:[#allocation2 + $0x18] sm:$0xff] %vm189_vm9, %v861_v56  ;;  %809 = vmatmul.mubr.f32.vlgmr.msra.gmra.mxu0 %v195_v63  ;;  %v369_v63 = vld [vmem:[%s1246_s2 + $0x40] sm:$0xff]  ;;  %746 = vmatprep.subr.mxu1 %v385_v62 }
  0x88   :  { %747 = vmatpush3.msra.mxu1 %v369_v63 }
  0x8a   :  { %v196_v0 = vld [vmem:[#allocation2 + $0x10] sm:$0xff] }
  0x8b   :  { %811 = vmatprep.mubr.f32.mxu0 %v196_v0  ;;  %v384_v0 = vld [vmem:[%s1246_s2 + $0xb8] sm:$0xff] }
  0x8c   :  { %748 = vmatprep.subr.mxu1 %v384_v0 }
  0x8e   :  { %v197_v2 = vld [vmem:[#allocation2 + $0x18] sm:$0xff] }
  0x8f   :  { %812 = vmatmul.mubr.f32.gmra.mxu0 %v197_v2  ;;  %v368_v2 = vld [vmem:[%s1246_s2 + $0x38] sm:$0xff] }
  0x90   :  { %749 = vmatpush3.msra.mxu1 %v368_v2 }
  0x91   :  { %750 = vmatprep.subr.mxu1 %v383_v3 }
 0x147   :  { %v810_v6 = vpop.f32.mrf.mxu0 }
 0x148   :  { %v274_v8 = vadd.f32 %v810_v6, %v201_v5  ;;  %v382_v6 = vld [vmem:[%s1246_s2 + $0xa8] sm:$0xff] }
 0x149   :  { %v268_v9 = vpop.f32.mrf.mxu0 }
 0x14a   :  { %v288_v10 = vmax.f32 %v274_v8, 0.0  ;;  %v269_v11 = vadd.f32 %v268_v9, %v201_v5  ;;  %v366_v8 = vld [vmem:[%s1246_s2 + $0x28] sm:$0xff] }
 0x14c   :  { %v287_v12 = vmax.f32 %v269_v11, 0.0  ;;  %v295_v13 = vsel %vm291_vm10, %v288_v10, 0.0 }
 0x14d   :  { %296 = vadd.xlane.f32.xlu1 %v295_v13 }
 0x14e   :  { %v292_v14 = vsel %vm291_vm10, %v287_v12, 0.0 }
 0x14f   :  { %v813_v15 = vpop.f32.mrf.mxu0  ;;  %293 = vadd.xlane.f32.xlu0 %v292_v14 }
 0x150   :  { %v284_v17 = vadd.f32 %v813_v15, %v201_v5 }
 0x151   :  { %v278_v16 = vpop.f32.mrf.mxu0 }
 0x152   :  { %v279_v18 = vadd.f32 %v278_v16, %v201_v5  ;;  %v290_v20 = vmax.f32 %v284_v17, 0.0  ;;  %v367_v5 = vld [vmem:[%s1246_s2 + $0x30] sm:$0xff]  ;;  %v381_v17 = vld [vmem:[%s1246_s2 + $0xa0] sm:$0xff] }
 0x153   :  { %751 = vmatpush3.msra.mxu1 %v367_v5 }
 0x154   :  { %v289_v19 = vmax.f32 %v279_v18, 0.0  ;;  %v301_v23 = vsel %vm291_vm10, %v290_v20, 0.0  ;;  %752 = vmatprep.subr.mxu1 %v382_v6  ;;  %v365_v18 = vld [vmem:[%s1246_s2 + $0x20] sm:$0xff] }
 0x155   :  { %753 = vmatpush3.msra.mxu1 %v366_v8 }
 0x156   :  { %v298_v21 = vsel %vm291_vm10, %v289_v19, 0.0  ;;  %754 = vmatprep.subr.mxu1 %v381_v17 }
 0x157   :  { %299 = vadd.xlane.f32.xlu0 %v298_v21  ;;  %755 = vmatpush3.msra.mxu1 %v365_v18  ;;  %v380_v21 = vld [vmem:[%s1246_s2 + $0x98] sm:$0xff] }
 0x158   :  { %756 = vmatprep.subr.mxu1 %v380_v21 }
 0x15b   :  { %302 = vadd.xlane.f32.xlu0 %v301_v23 }
 0x1d6   :  { %v297_v24 = vpop.xlane.xlu1 %296 }
 0x1d7   :  { %v306_v25 = vmul.f32 0.015625, %v297_v24  ;;  %v364_v24 = vld [vmem:[%s1246_s2 + $0x18] sm:$0xff] }
 0x1d8   :  { %v294_v26 = vpop.xlane.xlu0 %293  ;;  %757 = vmatpush3.msra.mxu1 %v364_v24 }
 0x1d9   :  { %v1042_v28 = vsub.f32 %v288_v10, %v306_v25  ;;  %v305_v29 = vmul.f32 0.015625, %v294_v26  ;;  %v379_v25 = vld [vmem:[%s1246_s2 + $0x90] sm:$0xff] }
 0x1da   :  { %v363_v26 = vld [vmem:[%s1246_s2 + $0x10] sm:$0xff]  ;;  %758 = vmatprep.subr.mxu1 %v379_v25 }
 0x1db   :  { %v1044_v30 = vsub.f32 %v287_v12, %v305_v29  ;;  %v314_v31 = vmul.f32 %v1042_v28, %v1042_v28  ;;  %759 = vmatpush3.msra.mxu1 %v363_v26 }
 0x1dd   :  { %v320_v32 = vsel %vm291_vm10, %v314_v31, 0.0  ;;  %v313_v33 = vmul.f32 %v1044_v30, %v1044_v30  ;;  %v355_v31 = vsub.s32 2, %v907_v7 }
 0x1de   :  { %321 = vadd.xlane.f32.xlu0 %v320_v32  ;;  %v378_v32 = vld [vmem:[%s1246_s2 + $0x88] sm:$0xff] }
 0x1df   :  { %v317_v34 = vsel %vm291_vm10, %v313_v33, 0.0  ;;  %v362_v33 = vld [vmem:[%s1246_s2 + $0x8] sm:$0xff]  ;;  %760 = vmatprep.subr.mxu1 %v378_v32 }
 0x1e0   :  { %318 = vadd.xlane.f32.xlu1 %v317_v34  ;;  %v300_v35 = vpop.xlane.xlu0 %299  ;;  %761 = vmatpush3.msra.mxu1 %v362_v33 }
 0x1e1   :  { %v307_v36 = vmul.f32 0.015625, %v300_v35 }
 0x1e3   :  { %v1052_v37 = vsub.f32 %v289_v19, %v307_v36  ;;  %v377_v36 = vld [vmem:[%s1246_s2 + $0x80] sm:$0xff] }
 0x1e4   :  { %v303_v39 = vpop.xlane.xlu0 %302  ;;  %762 = vmatprep.subr.mxu1 %v377_v36 }
 0x1e5   :  { %v308_v40 = vmul.f32 0.015625, %v303_v39  ;;  %v315_v42 = vmul.f32 %v1052_v37, %v1052_v37 }
 0x1e7   :  { %v1056_v43 = vsub.f32 %v290_v20, %v308_v40  ;;  %v323_v44 = vsel %vm291_vm10, %v315_v42, 0.0  ;;  %v347_v20 = vsub.s32 1, %v907_v7  ;;  %v361_v40 = vld [vmem:[%s1246_s2] sm:$0xff]  ;;  %s863_s2 = smov [#allocation4]  }
 0x1e8   :  { %324 = vadd.xlane.f32.xlu1 %v323_v44  ;;  %v356_v44 = vrot.slane %v1035_v4, %v355_v31  ;;  %763 = vmatpush3.msra.mxu1 %v361_v40 }
 0x1e9   :  { %v316_v45 = vmul.f32 %v1056_v43, %v1056_v43  ;;  %v348_v35 = vrot.slane %v1035_v4, %v347_v20 }
 0x1eb   :  { %v326_v46 = vsel %vm291_vm10, %v316_v45, 0.0 }
 0x1ec   :  { %327 = vadd.xlane.f32.xlu0 %v326_v46 }
 0x267   :  { %v322_v9 = vpop.xlane.xlu0 %321 }
 0x268   :  { %v330_v10 = vmul.f32 0.015625, %v322_v9 }
 0x269   :  { %v319_v11 = vpop.xlane.xlu1 %318 }
 0x26a   :  { %v334_v12 = vadd.f32 1e-05, %v330_v10  ;;  %v329_v13 = vmul.f32 0.015625, %v319_v11 }
 0x26c   :  { %821 = vrsqrt.f32 %v334_v12  ;;  %v333_v14 = vadd.f32 1e-05, %v329_v13 }
 0x26e   :  { %823 = vrsqrt.f32 %v333_v14 }
 0x271   :  { %v325_v15 = vpop.xlane.xlu1 %324 }
 0x272   :  { %v331_v16 = vmul.f32 0.015625, %v325_v15 }
 0x274   :  { %v335_v19 = vadd.f32 1e-05, %v331_v16 }
 0x275   :  { %v328_v23 = vpop.xlane.xlu0 %327 }
 0x276   :  { %825 = vrsqrt.f32 %v335_v19  ;;  %v332_v29 = vmul.f32 0.015625, %v328_v23  ;;  %v460_v23 = vsub.s32 3, %v907_v7 }
 0x278   :  { %v336_v34 = vadd.f32 1e-05, %v332_v29  ;;  %v461_v25 = vrot.slane %v1035_v4, %v460_v23 }
 0x279   :  { %v822_v39 = vpop.eup %821 }
 0x27a   :  { %827 = vrsqrt.f32 %v336_v34  ;;  %v342_v42 = vmul.f32 %v822_v39, %v1042_v28 }
 0x27b   :  { %v824_v45 = vpop.eup %823 }
 0x27c   :  { %v350_v46 = vmul.f32 %v348_v35, %v342_v42  ;;  %v341_v47 = vmul.f32 %v824_v45, %v1044_v30 }
 0x27e   :  { %v358_v48 = vadd.f32 %v356_v44, %v350_v46  ;;  %v349_v49 = vmul.f32 %v348_v35, %v341_v47 }
 0x280   :  { %415 = vrot.lane.b32.xlu0 %v358_v48, %s860_s0  ;;  %v357_v50 = vadd.f32 %v356_v44, %v349_v49  ;;  %v394_v51 = vrot.slane %v358_v48, 7  ;;  %v431_v52 = vrot.slane %v358_v48, 1 }
 0x282   :  { %v393_v53 = vrot.slane %v357_v50, 7  ;;  %v430_v54 = vrot.slane %v357_v50, 1  ;;  %413 = vrot.lane.b32.xlu1 %v357_v50, %s860_s0 }
 0x283   :  { %v826_v28 = vpop.eup %825 }
 0x284   :  { %v436_v55 = vsel %vm151_vm0, %v430_v54, %v431_v52  ;;  %v343_v57 = vmul.f32 %v826_v28, %v1052_v37  ;;  %v399_v30 = vsel %vm104_vm3, %v393_v53, %v394_v51 }
 0x285   :  { %442 = vst.msk [vmem:[#allocation3 + $0x8] sm:$0xff] %vm291_vm10, %v436_v55  ;;  %406 = vst.msk [vmem:[#allocation3 + $0x10] sm:$0xff] %vm291_vm10, %v399_v30 }
 0x286   :  { %446 = vst.msk [vmem:[#allocation3 + $0x8] sm:$0xff] %vm425_vm11, %v861_v56  ;;  %v351_v58 = vmul.f32 %v348_v35, %v343_v57 }
 0x287   :  { %v828_v59 = vpop.eup %827 }
 0x288   :  { %v359_v60 = vadd.f32 %v356_v44, %v351_v58  ;;  %v344_v61 = vmul.f32 %v828_v59, %v1056_v43 }
 0x28a   :  { %417 = vrot.lane.b32.xlu1 %v359_v60, %s860_s0  ;;  %v395_v62 = vrot.slane %v359_v60, 7  ;;  %v432_v63 = vrot.slane %v359_v60, 1  ;;  %v352_v37 = vmul.f32 %v348_v35, %v344_v61 }
 0x28c   :  { %v435_v0 = vsel %vm151_vm0, %v431_v52, %v432_v63  ;;  %v360_v2 = vadd.f32 %v356_v44, %v352_v37  ;;  %v398_v3 = vsel %vm104_vm3, %v394_v51, %v395_v62 }
 0x28d   :  { %v439_v5 = vsel %vm942_vm4, %v435_v0, 0.0  ;;  %v403_v6 = vsel %vm976_vm6, %v398_v3, 0.0  ;;  %v451_v8 = vld [vmem:[#allocation3 + $0x8] sm:$0xff] }
 0x28e   :  { %443 = vst.msk [vmem:[#allocation3 + $0x18] sm:$0xff] %vm291_vm10, %v439_v5  ;;  %419 = vrot.lane.b32.xlu1 %v360_v2, %s860_s0  ;;  %v396_v43 = vrot.slane %v360_v2, 7  ;;  %v433_v9 = vrot.slane %v360_v2, 1  ;;  %407 = vst.msk [vmem:[#allocation3 + $0x20] sm:$0xff] %vm291_vm10, %v403_v6  ;;  %526 = vmatprep.mubr.f32.mxu1 %v451_v8  ;;  %s704_s0 = sshll.u32 %s863_s2, 4  ;;  %s705_s0 = int_to_ptr.vmem [resolvable:$true] %s704_s0 }
 0x28f   :  { %447 = vst.msk [vmem:[#allocation3 + $0x18] sm:$0xff] %vm425_vm11, %v861_v56  ;;  %s837_s12 = scalar_lea.vmem %s705_s0, 16  ;;  %s841_s13 = scalar_lea.vmem %s705_s0, 32 }
 0x290   :  { %v434_v27 = vsel %vm151_vm0, %v432_v63, %v433_v9  ;;  %v437_v41 = vsel %vm151_vm0, %v433_v9, %v430_v54  ;;  %v400_v10 = vsel %vm104_vm3, %v396_v43, %v393_v53  ;;  %v397_v11 = vsel %vm104_vm3, %v395_v62, %v396_v43  ;;  %p838_p0 = scmp.ne.s32.totalorder %s705_s0, %s837_s12  ;;  %p842_p1 = scmp.lt.s32.totalorder %s705_s0, %s705_s0 }
 0x291   :  { %v441_v12 = vsel %vm967_vm5, %v437_v41, 0.0  ;;  %444 = vst.msk [vmem:[#allocation3 + $0x28] sm:$0xff] %vm291_vm10, %v434_v27  ;;  %v401_v13 = vsel %vm932_vm2, %v400_v10, 0.0  ;;  %408 = vst.msk [vmem:[#allocation3 + $0x30] sm:$0xff] %vm291_vm10, %v397_v11  ;;  %v862_v10 = vmov 0   ;;  %p843_p2 = scmp.lt.s32.totalorder %s841_s13, %s837_s12 }
 0x292   :  { %445 = vst.msk [vmem:[#allocation3 + $0x38] sm:$0xff] %vm291_vm10, %v441_v12  ;;  %405 = vst.msk [vmem:[#allocation3] sm:$0xff] %vm291_vm10, %v401_v13  ;;  %819 = vset.pattern.permute.xlu1 %v862_v10  ;;  %820 = vset.pattern.permute.xlu0 %v862_v10 }
 0x293   :  { %448 = vst.msk [vmem:[#allocation3 + $0x28] sm:$0xff] %vm425_vm11, %v861_v56  ;;  %449 = vst.msk [vmem:[#allocation3 + $0x38] sm:$0xff] %vm425_vm11, %v861_v56  ;;  %p844_p3 = por %p843_p2, %p842_p1 }
 0x295   :  { %p845_p4 = pnand %p844_p3, %p838_p0 }
 0x296   :  { %v453_v22 = vld [vmem:[#allocation3 + $0x18] sm:$0xff] }
 0x29a   :  { %v455_v17 = vld [vmem:[#allocation3 + $0x28] sm:$0xff]  ;;  %v457_v56 = vld [vmem:[#allocation3 + $0x38] sm:$0xff] }
 0x2f2   :  { %v416_v14 = vpop.permute.xlu0 %415 }
 0x2f3   :  { %427 = vst.msk [vmem:[#allocation3 + $0x10] sm:$0xff] %vm425_vm11, %v416_v14 }
 0x2f4   :  { %v414_v38 = vpop.permute.xlu1 %413 }
 0x2f5   :  { %426 = vst.msk [vmem:[#allocation3] sm:$0xff] %vm425_vm11, %v414_v38 }
 0x2fa   :  { %v452_v19 = vld [vmem:[#allocation3 + $0x10] sm:$0xff] }
 0x2fc   :  { %v418_v15 = vpop.permute.xlu1 %417  ;;  %v450_v16 = vld [vmem:[#allocation3] sm:$0xff] }
 0x2fd   :  { %428 = vst.msk [vmem:[#allocation3 + $0x20] sm:$0xff] %vm425_vm11, %v418_v15  ;;  %527 = vmatmul.mubr.f32.vlgmr.msra.gmra.mxu1 %v450_v16 }
 0x2fe   :  { %531 = vmatprep.mubr.f32.mxu1 %v453_v22 }
 0x300   :  { %v420_v18 = vpop.permute.xlu1 %419 }
 0x301   :  { %429 = vst.msk [vmem:[#allocation3 + $0x30] sm:$0xff] %vm425_vm11, %v420_v18  ;;  %532 = vmatmul.mubr.f32.gmra.mxu1 %v452_v19 }
 0x302   :  { %536 = vmatprep.mubr.f32.mxu1 %v455_v17 }
 0x304   :  { %v454_v20 = vld [vmem:[#allocation3 + $0x20] sm:$0xff] }
 0x305   :  { %537 = vmatmul.mubr.f32.gmra.mxu1 %v454_v20 }
 0x306   :  { %541 = vmatprep.mubr.f32.mxu1 %v457_v56  ;;  %v605_v56 = vsub.s32 4, %v907_v7 }
 0x308   :  { %v456_v21 = vld [vmem:[#allocation3 + $0x30] sm:$0xff]  ;;  %v606_v23 = vrot.slane %v1035_v4, %v605_v56 }
 0x309   :  { %542 = vmatmul.mubr.f32.gmra.mxu1 %v456_v21  ;;  %v613_v21 = vsub.s32 5, %v907_v7 }
 0x3bd   :  { %v764_v24 = vpop.f32.mrf.mxu1 }
 0x3bf   :  { %v765_v26 = vpop.f32.mrf.mxu1 }
 0x3c0   :  { %v766_v29 = vadd.f32 %v765_v26, %v764_v24  ;;  %v621_v24 = vsub.s32 6, %v907_v7 }
 0x3c1   :  { %v767_v31 = vpop.f32.mrf.mxu1 }
 0x3c2   :  { %v529_v32 = vadd.f32 %v766_v29, %v461_v25  ;;  %v614_v29 = vrot.slane %v1035_v4, %v613_v21 }
 0x3c3   :  { %v768_v33 = vpop.f32.mrf.mxu1 }
 0x3c4   :  { %v769_v34 = vadd.f32 %v768_v33, %v767_v31  ;;  %v547_v35 = vmax.f32 %v529_v32, 0.0  ;;  %v622_v32 = vrot.slane %v1035_v4, %v621_v24 }
 0x3c5   :  { %v770_v36 = vpop.f32.mrf.mxu1 }
 0x3c6   :  { %v534_v39 = vadd.f32 %v769_v34, %v461_v25  ;;  %v551_v40 = vsel %vm291_vm10, %v547_v35, 0.0 }
 0x3c7   :  { %552 = vadd.xlane.f32.xlu0 %v551_v40  ;;  %v771_v42 = vpop.f32.mrf.mxu1 }
 0x3c8   :  { %v772_v44 = vadd.f32 %v771_v42, %v770_v36  ;;  %v548_v45 = vmax.f32 %v534_v39, 0.0 }
 0x3c9   :  { %v773_v46 = vpop.f32.mrf.mxu1 }
 0x3ca   :  { %v539_v47 = vadd.f32 %v772_v44, %v461_v25  ;;  %v554_v48 = vsel %vm291_vm10, %v548_v45, 0.0 }
 0x3cb   :  { %v774_v49 = vpop.f32.mrf.mxu1  ;;  %555 = vadd.xlane.f32.xlu1 %v554_v48 }
 0x3cc   :  { %v775_v50 = vadd.f32 %v774_v49, %v773_v46  ;;  %v549_v51 = vmax.f32 %v539_v47, 0.0 }
 0x3ce   :  { %v544_v52 = vadd.f32 %v775_v50, %v461_v25  ;;  %v557_v53 = vsel %vm291_vm10, %v549_v51, 0.0 }
 0x3cf   :  { %558 = vadd.xlane.f32.xlu0 %v557_v53 }
 0x3d0   :  { %v550_v54 = vmax.f32 %v544_v52, 0.0 }
 0x3d2   :  { %v560_v28 = vsel %vm291_vm10, %v550_v54, 0.0 }
 0x3d3   :  { %561 = vadd.xlane.f32.xlu0 %v560_v28 }
 0x450   :  { %v553_v55 = vpop.xlane.xlu0 %552 }
 0x451   :  { %v563_v57 = vmul.f32 0.015625, %v553_v55 }
 0x453   :  { %v567_v30 = vsub.f32 %v547_v35, %v563_v57 }
 0x454   :  { %v556_v58 = vpop.xlane.xlu1 %555 }
 0x455   :  { %v564_v59 = vmul.f32 0.015625, %v556_v58  ;;  %v571_v60 = vmul.f32 %v567_v30, %v567_v30 }
 0x457   :  { %v568_v61 = vsub.f32 %v548_v45, %v564_v59  ;;  %v575_v62 = vsel %vm291_vm10, %v571_v60, 0.0  ;;  %v645_v59 = vsub.s32 7, %v907_v7 }
 0x458   :  { %576 = vadd.xlane.f32.xlu1 %v575_v62  ;;  %v559_v63 = vpop.xlane.xlu0 %558 }
 0x459   :  { %v565_v37 = vmul.f32 0.015625, %v559_v63  ;;  %v572_v0 = vmul.f32 %v568_v61, %v568_v61 }
 0x45b   :  { %v569_v2 = vsub.f32 %v549_v51, %v565_v37  ;;  %v578_v3 = vsel %vm291_vm10, %v572_v0, 0.0 }
 0x45c   :  { %579 = vadd.xlane.f32.xlu0 %v578_v3  ;;  %v562_v5 = vpop.xlane.xlu0 %561 }
 0x45d   :  { %v566_v6 = vmul.f32 0.015625, %v562_v5  ;;  %v573_v8 = vmul.f32 %v569_v2, %v569_v2  ;;  %v669_v5 = vand.u32 127, %v19_v1 }
 0x45f   :  { %v570_v43 = vsub.f32 %v550_v54, %v566_v6  ;;  %v581_v9 = vsel %vm291_vm10, %v573_v8, 0.0  ;;  %v674_v6 = vadd.s32 4294967288, %v669_v5 }
 0x460   :  { %582 = vadd.xlane.f32.xlu1 %v581_v9  ;;  %v672_v9 = vsub.s32 %v669_v5, %v907_v7 }
 0x461   :  { %v574_v27 = vmul.f32 %v570_v43, %v570_v43 }
 0x463   :  { %v584_v41 = vsel %vm291_vm10, %v574_v27, 0.0  ;;  %v688_v27 = vadd.s32 4294967272, %v669_v5 }
 0x464   :  { %585 = vadd.xlane.f32.xlu0 %v584_v41 }
 0x4e1   :  { %v577_v11 = vpop.xlane.xlu1 %576 }
 0x4e2   :  { %v587_v12 = vmul.f32 0.015625, %v577_v11 }
 0x4e4   :  { %v591_v13 = vadd.f32 1e-05, %v587_v12 }
 0x4e5   :  { %v580_v14 = vpop.xlane.xlu0 %579 }
 0x4e6   :  { %829 = vrsqrt.f32 %v591_v13  ;;  %v588_v38 = vmul.f32 0.015625, %v580_v14  ;;  %v691_v14 = vsub.s32 %v688_v27, %v907_v7 }
 0x4e8   :  { %v592_v22 = vadd.f32 1e-05, %v588_v38 }
 0x4e9   :  { %v583_v15 = vpop.xlane.xlu1 %582 }
 0x4ea   :  { %831 = vrsqrt.f32 %v592_v22  ;;  %v589_v16 = vmul.f32 0.015625, %v583_v15 }
 0x4ec   :  { %v593_v17 = vadd.f32 1e-05, %v589_v16 }
 0x4ed   :  { %v586_v18 = vpop.xlane.xlu0 %585 }
 0x4ee   :  { %833 = vrsqrt.f32 %v593_v17  ;;  %v590_v19 = vmul.f32 0.015625, %v586_v18 }
 0x4f0   :  { %v594_v20 = vadd.f32 1e-05, %v590_v19 }
 0x4f2   :  { %835 = vrsqrt.f32 %v594_v20 }
 0x4f3   :  { %v830_v25 = vpop.eup %829 }
 0x4f4   :  { %v599_v26 = vmul.f32 %v830_v25, %v567_v30 }
 0x4f6   :  { %v607_v31 = vmul.f32 %v606_v23, %v599_v26 }
 0x4f7   :  { %v832_v33 = vpop.eup %831 }
 0x4f8   :  { %v615_v34 = vadd.f32 %v614_v29, %v607_v31  ;;  %v600_v35 = vmul.f32 %v832_v33, %v568_v61 }
 0x4fa   :  { %v623_v36 = vmul.f32 %v622_v32, %v615_v34  ;;  %v608_v39 = vmul.f32 %v606_v23, %v600_v35 }
 0x4fb   :  { %v834_v40 = vpop.eup %833 }
 0x4fc   :  { %v627_v42 = vsel %vm291_vm10, %v623_v36, 0.0  ;;  %v616_v44 = vadd.f32 %v614_v29, %v608_v39  ;;  %v601_v45 = vmul.f32 %v834_v40, %v569_v2 }
 0x4fd   :  { %628 = vadd.xlane.f32.xlu1 %v627_v42 }
 0x4fe   :  { %v624_v46 = vmul.f32 %v622_v32, %v616_v44  ;;  %v609_v47 = vmul.f32 %v606_v23, %v601_v45 }
 0x4ff   :  { %v836_v48 = vpop.eup %835 }
 0x500   :  { %v630_v49 = vsel %vm291_vm10, %v624_v46, 0.0  ;;  %v617_v50 = vadd.f32 %v614_v29, %v609_v47  ;;  %v602_v51 = vmul.f32 %v836_v48, %v570_v43  ;;  %v677_v43 = vsub.s32 %v674_v6, %v907_v7 }
 0x501   :  { %631 = vadd.xlane.f32.xlu0 %v630_v49 }
 0x502   :  { %v625_v52 = vmul.f32 %v622_v32, %v617_v50  ;;  %v610_v53 = vmul.f32 %v606_v23, %v602_v51 }
 0x504   :  { %v633_v54 = vsel %vm291_vm10, %v625_v52, 0.0  ;;  %v618_v28 = vadd.f32 %v614_v29, %v610_v53 }
 0x505   :  { %634 = vadd.xlane.f32.xlu1 %v633_v54 }
 0x506   :  { %v626_v55 = vmul.f32 %v622_v32, %v618_v28 }
 0x508   :  { %v636_v57 = vsel %vm291_vm10, %v626_v55, 0.0 }
 0x509   :  { %637 = vadd.xlane.f32.xlu0 %v636_v57 }
 0x516   :  { %641 = vperm.xlu1 %819, %v1035_v4   ;;  %v681_v4 = vadd.s32 4294967280, %v669_v5 }
 0x518   :  { %v684_v10 = vsub.s32 %v681_v4, %v907_v7 }
 0x586   :  { %v629_v30 = vpop.xlane.xlu1 %628 }
 0x58a   :  { %v632_v62 = vpop.xlane.xlu0 %631 }
 0x58e   :  { %v635_v58 = vpop.xlane.xlu1 %634 }
 0x592   :  { %v642_v60 = vpop.permute.xlu1 %641  ;;  %v638_v2 = vpop.xlane.xlu0 %637 }
 0x593   :  { %v646_v61 = vrot.slane %v642_v60, %v645_v59 }
 0x595   :  { %v648_v63 = vadd.f32 %v646_v61, %v629_v30  ;;  %v649_v37 = vadd.f32 %v646_v61, %v632_v62  ;;  %v650_v0 = vadd.f32 %v646_v61, %v635_v58  ;;  %v651_v3 = vadd.f32 %v646_v61, %v638_v2 }
 0x597   :  { %657 = vperm.xlu0 %820, %v648_v63   ;;  %660 = vperm.xlu1 %819, %v649_v37  }
 0x59b   :  { %663 = vperm.xlu1 %819, %v650_v0  }
 0x59f   :  { %666 = vperm.xlu1 %819, %v651_v3  }
 0x612   :  { %v661_v8 = vpop.permute.xlu1 %660  ;;  %v658_v41 = vpop.permute.xlu0 %657 }
 0x613   :  { %v678_v12 = vrot.slane %v661_v8, %v677_v43  ;;  %v673_v13 = vrot.slane %v658_v41, %v672_v9 }
 0x615   :  { %v680_v22 = vsel %vm679_vm12, %v678_v12, %v673_v13 }
 0x616   :  { %v664_v11 = vpop.permute.xlu1 %663 }
 0x617   :  { %v685_v38 = vrot.slane %v664_v11, %v684_v10 }
 0x619   :  { %v687_v16 = vsel %vm686_vm13, %v685_v38, %v680_v22 }
 0x61a   :  { %v667_v1 = vpop.permute.xlu1 %666 }
 0x61b   :  { %v692_v15 = vrot.slane %v667_v1, %v691_v14 }
 0x61d   :  { %v694_v17 = vsel %vm693_vm14, %v692_v15, %v687_v16 }
 0x61e   :  { %697 = vst.msk [vmem:[#allocation4] sm:$0x1] %vm696_vm15, %v694_v17 }
 0x61f   :  { %848 = shalt.err (!%p845_p4)
}
 0x620   :  { %707 = dma.vmem_to_hbm [thread:$0]  %s705_s0, 16, %s1248_s4, [#allocation5]  }
 0x621   :  { %857 = dma.done.wait [#allocation5], 16  }
 0x622   :  { %858 = vsyncadd [#allocation5], 4294967280 }
 0x623   :  { %711 = vsyncpa [#allocation5], 1 }

</bundles_post_ra>
